<compile_context>
chip_gen: v5e
topology: v5e:2x2
jax: 0.10.0
libtpu: 0.0.40
codegen_flags: <defaults>
</compile_context>

<pallas_src>
import jax
import jax.numpy as jnp
from jax.experimental import pallas as pl
from jax.experimental.pallas import tpu as pltpu


def _make_kernel(n_s: int, ts: int, s_rem: int, acc_in_out: bool, compute_dtype):
    """Build the kernel body with all shape-dependent choices made statically."""
    single_step = n_s == 1
    # f32-faithful path (matches torch f32 matmul); bf16 opt-in skips the
    # multi-pass MXU decomposition.
    precision = jax.lax.Precision.HIGHEST if compute_dtype is None else None

    def kernel(attn_ref, v_ref, o_ref, *scratch):
        a = attn_ref[...]
        v = v_ref[...]

        if s_rem:  # static: ts does not divide S -> mask the reduction tail.
            s = pl.program_id(3)
            limit = jnp.where(s == n_s - 1, s_rem, ts)
            a_col = jax.lax.broadcasted_iota(jnp.int32, a.shape, dimension=1)
            a = jnp.where(a_col < limit, a, 0.0)
            v_row = jax.lax.broadcasted_iota(jnp.int32, v.shape, dimension=0)
            v = jnp.where(v_row < limit, v, 0.0)

        if compute_dtype is not None:  # free VPU cast under the MXU
            a = a.astype(compute_dtype)
            v = v.astype(compute_dtype)

        part = jnp.dot(a, v, preferred_element_type=jnp.float32,
                       precision=precision)

        if single_step:
            # Fast path: whole reduction in one step — no init/finalize.
            o_ref[...] = part.astype(o_ref.dtype)
            return

        s = pl.program_id(3)
        if acc_in_out:
            # f32 output: accumulate straight into the VMEM-resident output
            # block (same block index across the s axis) — no scratch buffer
            # and no final copy pass.
            @pl.when(s == 0)
            def _():
                o_ref[...] = part

            @pl.when(s > 0)
            def _():
                o_ref[...] += part
        else:
            acc_ref = scratch[0]

            @pl.when(s == 0)
            def _():
                acc_ref[...] = jnp.zeros_like(acc_ref)

            acc_ref[...] += part

            @pl.when(s == n_s - 1)
            def _():
                o_ref[...] = acc_ref[...].astype(o_ref.dtype)

    return kernel


def llm_attention(
    values: jax.Array,
    attn: jax.Array,
    *,
    tq: int = 512,        # query-tile target (multiple of 16 when Q is tiled)
    ts: int = 1024,       # reduction-tile target (multiple of 128 when S is tiled)
    td: int = 2048,       # d_model-tile cap (multiple of 128 when D is tiled)
    compute_dtype=None,   # e.g. jnp.bfloat16: cast inside the kernel before the dot
) -> jax.Array:
    """attn @ values with a (B, Q, D, S) tiled grid and f32 accumulation.

    Dropout is applied in eval mode (identity), matching `model.eval()`.
    # TODO(synk): training-mode dropout would need pltpu.prng_seed /
    # pltpu.prng_random_bits in-kernel; it cannot match torch RNG bitwise.
    """
    if attn.shape[-1] != values.shape[1]:
        raise ValueError(f"Shape mismatch: attn {attn.shape}, values {values.shape}")
    B, S, D = values.shape
    Ba, Q, _ = attn.shape
    if Ba != B:
        raise ValueError(f"Batch mismatch: attn {attn.shape}, values {values.shape}")

    out_dtype = values.dtype

    # --- tile selection: no wrapper padding; full-dim blocks for small dims ---
    # Q/D tails rely on Pallas partial blocks (OOB output elements are dropped
    # on writeback); only the S (reduction) tail needs an explicit mask.
    if Q <= tq:
        tq = Q
    else:
        assert tq % 16 == 0, "tq must be a multiple of 16 when Q is tiled"
    if D <= td:
        td = D
    else:
        assert td % 128 == 0, "td must be a multiple of 128 when D is tiled"
    if S <= ts:
        ts = S            # single reduction step, no tail mask needed
    else:
        assert ts % 128 == 0, "ts must be a multiple of 128 when S is tiled"

    n_q = pl.cdiv(Q, tq)
    n_d = pl.cdiv(D, td)
    n_s = pl.cdiv(S, ts)
    s_rem = S % ts

    acc_in_out = (out_dtype == jnp.float32)
    use_scratch = (n_s > 1) and (not acc_in_out)

    kernel = _make_kernel(n_s, ts, s_rem, acc_in_out, compute_dtype)
    scratch_shapes = [pltpu.VMEM((tq, td), jnp.float32)] if use_scratch else []

    a_item = attn.dtype.itemsize
    v_item = values.dtype.itemsize
    o_item = jnp.dtype(out_dtype).itemsize

    # Double-buffered inputs + output tile (+ optional f32 scratch).  Keep the
    # total well under ~48 MiB so the same tiling fits v7x's 64 MiB VMEM; the
    # explicit limit also lifts v5e's 16 MiB scoped default.
    vmem_bytes = (2 * tq * ts * a_item
                  + 2 * ts * td * v_item
                  + 2 * tq * td * o_item
                  + (tq * td * 4 if use_scratch else 0))
    vmem_limit = int(min(max(vmem_bytes + (4 << 20), 32 << 20), 96 << 20))

    cost = pl.CostEstimate(
        flops=2 * B * Q * S * D,
        transcendentals=0,
        bytes_accessed=B * Q * S * a_item + B * S * D * v_item + B * Q * D * o_item,
    )

    out = pl.pallas_call(
        kernel,
        out_shape=jax.ShapeDtypeStruct((B, Q, D), out_dtype),
        grid_spec=pltpu.PrefetchScalarGridSpec(
            num_scalar_prefetch=0,
            grid=(B, n_q, n_d, n_s),
            in_specs=[
                pl.BlockSpec((pl.Squeezed(), tq, ts), lambda b, q, d, s: (b, q, s)),
                pl.BlockSpec((pl.Squeezed(), ts, td), lambda b, q, d, s: (b, s, d)),
            ],
            out_specs=pl.BlockSpec(
                (pl.Squeezed(), tq, td), lambda b, q, d, s: (b, q, d)
            ),
            scratch_shapes=scratch_shapes,
        ),
        compiler_params=pltpu.CompilerParams(
            # B/Q/D are independent -> "parallel" (v7x 2-TC megacore split;
            # with td == D the d axis is size 1, so batch/query supply the
            # >=2 parallel iterations).  S is the reduction -> "arbitrary".
            dimension_semantics=("parallel", "parallel", "parallel", "arbitrary"),
            vmem_limit_bytes=vmem_limit,
        ),
        cost_estimate=cost,
    )(attn, values)
    return out


if __name__ == "__main__":
    key = jax.random.PRNGKey(0)
    k_v, k_a = jax.random.split(key)

    # --- case 1: module-scale smoke test (single-step fast path) ---
    B, Q, S, D = 2, 8, 8, 32  # batch, query len, key/value len (seq), d_model
    values = jax.random.normal(k_v, (B, S, D), dtype=jnp.float32)
    attn_logits = jax.random.normal(k_a, (B, Q, S), dtype=jnp.float32)
    attn = jax.nn.softmax(attn_logits, axis=-1)
    ref = jnp.einsum("bqs,bsd->bqd", attn, values,
                     precision=jax.lax.Precision.HIGHEST)

    out = jax.block_until_ready(llm_attention(values, attn))
    assert out.shape == (B, Q, D)
    assert jnp.allclose(out, ref, atol=1e-5, rtol=1e-5)

    # In-kernel bf16 MXU path (no wrapper HBM pass; looser tolerance).
    out_bf16 = jax.block_until_ready(
        llm_attention(values, attn, compute_dtype=jnp.bfloat16)
    )
    assert jnp.allclose(out_bf16, ref, atol=3e-2, rtol=3e-2)

    # --- case 2: tiled reduction with a ragged S tail (mask + accumulate-in-output) ---
    B2, Q2, S2, D2 = 1, 64, 300, 256
    v2 = jax.random.normal(k_v, (B2, S2, D2), dtype=jnp.float32)
    a2 = jax.nn.softmax(
        jax.random.normal(k_a, (B2, Q2, S2), dtype=jnp.float32), axis=-1
    )
    ref2 = jnp.einsum("bqs,bsd->bqd", a2, v2,
                      precision=jax.lax.Precision.HIGHEST)
    out2 = jax.block_until_ready(llm_attention(v2, a2, ts=128))
    assert out2.shape == (B2, Q2, D2)
    assert jnp.allclose(out2, ref2, atol=1e-4, rtol=1e-4)

    print("KERNEL_OK")
</pallas_src>

<mosaic_0001>
module attributes {stable_mosaic.version = 11 : i64} {
  func.func @kernel(%arg0: i32, %arg1: i32, %arg2: i32, %arg3: i32, %arg4: memref<1x8x8xf32, #tpu.memory_space<vmem>>, %arg5: memref<1x8x32xf32, #tpu.memory_space<vmem>>, %arg6: memref<1x8x32xf32, #tpu.memory_space<vmem>>) attributes {dimension_semantics = [#tpu.dimension_semantics<parallel>, #tpu.dimension_semantics<parallel>, #tpu.dimension_semantics<parallel>, #tpu.dimension_semantics<arbitrary>], iteration_bounds = array<i64: 2, 1, 1, 1>, scalar_prefetch = 0 : i64, scratch_operands = 0 : i64, tpu.core_type = #tpu.core_type<tc>, window_params = [{transform_indices = @transform_0, window_bounds = array<i64: 1, 8, 8>}, {transform_indices = @transform_1, window_bounds = array<i64: 1, 8, 32>}, {transform_indices = @transform_2, window_bounds = array<i64: 1, 8, 32>}]} {
    %c0 = arith.constant 0 : index
    %c0_0 = arith.constant 0 : index
    %c0_1 = arith.constant 0 : index
    %0 = vector.load %arg4[%c0, %c0_0, %c0_1] : memref<1x8x8xf32, #tpu.memory_space<vmem>>, vector<1x8x8xf32>
    %1 = vector.shape_cast %0 : vector<1x8x8xf32> to vector<8x8xf32>
    %c0_2 = arith.constant 0 : index
    %c0_3 = arith.constant 0 : index
    %c0_4 = arith.constant 0 : index
    %2 = vector.load %arg5[%c0_2, %c0_3, %c0_4] : memref<1x8x32xf32, #tpu.memory_space<vmem>>, vector<1x8x32xf32>
    %3 = vector.shape_cast %2 : vector<1x8x32xf32> to vector<8x32xf32>
    %cst = arith.constant dense<0.000000e+00> : vector<8x32xf32>
    %4 = tpu.matmul %1, %3, %cst {dimension_numbers = #tpu.dot_dimension_numbers<[1], [0], [0], [1], [0, 0, 1, 1], [], []>, precision = #tpu.contract_precision<fp32>} : vector<8x8xf32>, vector<8x32xf32>, vector<8x32xf32> -> vector<8x32xf32>
    %c0_5 = arith.constant 0 : index
    %c0_6 = arith.constant 0 : index
    %c0_7 = arith.constant 0 : index
    %5 = vector.load %arg6[%c0_5, %c0_6, %c0_7] : memref<1x8x32xf32, #tpu.memory_space<vmem>>, vector<1x8x32xf32>
    %6 = vector.shape_cast %5 : vector<1x8x32xf32> to vector<8x32xf32>
    %7 = vector.shape_cast %4 : vector<8x32xf32> to vector<1x8x32xf32>
    tpu.vector_store %arg6[%c0_5, %c0_6, %c0_7], %7 {strides = array<i32>} : memref<1x8x32xf32, #tpu.memory_space<vmem>>, vector<1x8x32xf32>,
    return
  }
  func.func @transform_0(%arg0: i32, %arg1: i32, %arg2: i32, %arg3: i32) -> (i32, i32, i32) {
    %c0_i32 = arith.constant 0 : i32
    return %arg0, %arg1, %arg3 : i32, i32, i32
  }
  func.func @transform_1(%arg0: i32, %arg1: i32, %arg2: i32, %arg3: i32) -> (i32, i32, i32) {
    %c0_i32 = arith.constant 0 : i32
    return %arg0, %arg3, %arg2 : i32, i32, i32
  }
  func.func @transform_2(%arg0: i32, %arg1: i32, %arg2: i32, %arg3: i32) -> (i32, i32, i32) {
    %c0_i32 = arith.constant 0 : i32
    return %arg0, %arg1, %arg2 : i32, i32, i32
  }
}

</mosaic_0001>

<bundles_post_ra>
// kernel: tpu_custom_call.1
= control target key start
LH: loop header
LB: loop body
LE: loop exit
PB: predicated region body
PF: predicated region fallthrough
CT: control target
= control target key end

     0   :  { %7 = vsyncpa [#allocation3], 0  ;;  %s903_s0 = inlined_call_operand.hbm [shape: f32[2,8,8], index: 0, kind: input, shape index: {}]   ;;  %s904_s1 = inlined_call_operand.hbm [shape: f32[2,8,32], index: 1, kind: input, shape index: {}]   ;;  %s905_s2 = inlined_call_operand.hbm [shape: f32[2,8,32], index: 2, kind: output, shape index: {}]  }
   0x1   :  { %9 = vsyncpa [#allocation3 + $0x1], 0 }
   0x2   :  { %10 = vsyncpa [#allocation6], 0 }
   0x3   :  { %12 = vsyncpa [#allocation6 + $0x1], 0 }
   0x4   :  { %13 = vsyncpa [#allocation4], 0 }
   0x5   :  { %15 = vsyncpa [#allocation4 + $0x1], 0  ;;  %s770_s9 = smov 0   ;;  %s772_s10 = smov 0  }
   0x6   :  { %s774_s11 = smov 0   ;;  %s776_s12 = smov 0  }
   0x7   :  { %s778_s13 = smov 0   ;;  %s780_s14 = smov 0  }
   0x8 LB: > { %s524_s15 = sadd.s32 4294967295, %s753_s14   ;;  %s525_s16 = sadd.s32 4294967294, %s753_s14   ;;  %s753_s14 = sphi %s780_s14, %s21_s14   ;;  %s749_s13 = sphi %s778_s13, %s914_s13   ;;  %s745_s12 = sphi %s776_s12, %s913_s12   ;;  %s741_s11 = sphi %s774_s11, %s912_s11   ;;  %s737_s10 = sphi %s772_s10, %s911_s10   ;;  %s733_s9 = sphi %s770_s9, %s910_s9  }
   0x9   : > { %s47_s17 = sadd.s32 1, %s749_s13  ;;  %s58_s18 = sadd.s32 1, %s741_s11 }
   0xa   : > { %p49_p0 = scmp.ge.s32.totalorder %s47_s17, 2  ;;  %p65_p1 = scmp.ne.s32.totalorder %s741_s11, %s737_s10 }
   0xb   : > { %p66_p2 = scmp.eq.s32.totalorder %s753_s14, 0  ;;  %p71_p3 = scmp.ne.s32.totalorder %s737_s10, %s733_s9 }
   0xc   : > { %s916_s17 = smov (%p49_p0, %s47_s17), 0  ;;  %p72_p5 = scmp.eq.s32.totalorder %s524_s15, 0 }
   0xd   : > { %p811_p4 = por %p66_p2, %p65_p1  ;;  %s51_s20 = ssub.s32 %s749_s13, %s916_s17 }
   0xe   : > { %p129_p6 = scmp.eq.s32.totalorder %s524_s15, 1  ;;  %p56_p7 = scmp.eq.s32.totalorder %s51_s20, 0 }
   0xf   : > { %p817_p8 = por %p72_p5, %p71_p3  ;;  %p135_p10 = scmp.eq.s32.totalorder %s525_s16, 1 }
  0x10   : > { %p821_p9 = por %p129_p6, %p65_p1  ;;  %p527_p12 = scmp.ge.s32.totalorder %s753_s14, 2 }
  0x11   : > { %s826_s23 = scalar_select %p56_p7, %s741_s11, %s58_s18  }
  0x12   : > { %p828_p11 = por %p135_p10, %p71_p3  ;;  %p557_p13 = scmp.lt.s32.totalorder %s753_s14, 2 }
  0x13   : > { %s155_s25 = sand.u32 1, %s741_s11   ;;  %s529_s27 = sshll.u32 %s749_s13, 3 }
  0x14   : > { %s528_s26 = sshll.u32 %s155_s25, 3  ;;  %s165_s30 = scalar_lea.hbm %s903_s0, %s529_s27 }
  0x15   : > { %s159_s3 = scalar_lea.vmem [#allocation2], %s528_s26  ;;  %s167_s5 = sshll.u32 %s165_s30, 4  ;;  %s168_s5 = int_to_ptr.hbm [resolvable:$true] %s167_s5 }
  0x16   : > { %s169_s4 = sshll.u32 %s159_s3, 4  ;;  %p547_p0 = pnand %p557_p13, %p811_p4  ;;  %s170_s4 = int_to_ptr.vmem [resolvable:$true] %s169_s4 }
  0x17   : > { %p532_p1 = scmp.ge.s32.totalorder %s753_s14, 1  ;;  %p195_p2 = scmp.lt.s32.totalorder %s753_s14, 3 }
  0x18   : > { %s156_s6 = scalar_lea.sflag [#allocation3], %s155_s25  ;;  %s186_s15 = scalar_lea.hbm %s904_s1, %s529_s27 }
  0x19   : > { %549 = dma.hbm_to_vmem [thread:$0]  (!%p547_p0), %s168_s5, 128, %s170_s4, %s156_s6  }
  0x1a   : > { %p196_p3 = pnand %p532_p1, %p195_p2  ;;  %s180_s16 = scalar_lea.vmem [#allocation5], %s528_s26 }
  0x1b   : > { %s190_s18 = sshll.u32 %s180_s16, 4  ;;  %s188_s20 = sshll.u32 %s186_s15, 4  ;;  %s191_s18 = int_to_ptr.vmem [resolvable:$true] %s190_s18  ;;  %s189_s20 = int_to_ptr.hbm [resolvable:$true] %s188_s20 }
  0x1c   : > { %s177_s28 = scalar_lea.sflag [#allocation6], %s155_s25  ;;  %199 = sbr.rel (%p196_p3) target bundleno = 189 (0xbd), region = 28 }
  0x1d   : > { %552 = dma.hbm_to_vmem [thread:$0]  (!%p547_p0), %s189_s20, 128, %s191_s18, %s177_s28  }
  0x1e   : > { %s847_s19 = sand.u32 (!%p196_p3), 1, %s737_s10  }
  0x1f   : > { %s850_s29 = sshll.u32 (!%p196_p3), %s847_s19, 3  ;;  %s202_s30 = scalar_lea.sflag (!%p196_p3), [#allocation3], %s847_s19 }
  0x20   : > { %s205_s3 = scalar_lea.vmem (!%p196_p3), [#allocation2], %s850_s29 }
  0x21   : > { %720 = dma.done.wait (%p817_p8), %s202_s30, 128  }
  0x22   : > { %722 = vsyncadd (%p817_p8), %s202_s30, 4294967168  ;;  %s212_s25 = scalar_lea.sflag [#allocation6], %s847_s19  ;;  %s215_s26 = scalar_lea.vmem [#allocation5], %s850_s29 }
  0x23   : > { %724 = dma.done.wait (%p817_p8), %s212_s25, 128  }
  0x24   : > { %726 = vsyncadd (%p817_p8), %s212_s25, 4294967168  ;;  %vm244_vm0 = vcmask 64512   ;;  %v243_v0 = vld [vmem:[%s215_s26] sm:$0xff]  ;;  %v242_v1 = vld [vmem:[%s205_s3] sm:$0xff]  ;;  %s537_s21 = sshll.u32 %s745_s12, 3  ;;  %s241_s6 = scalar_lea.vmem [#allocation7], %s850_s29 }
  0x25   : > { %v263_v2 = vand.u32 4294901760, %v243_v0  ;;  %v246_v3 = vsel %vm244_vm0, %v242_v1, 0  ;;  %s409_s5 = scalar_lea.hbm %s905_s2, %s537_s21  ;;  %s411_s7 = sshll.u32 %s241_s6, 4  ;;  %vm394_vm1 = vcmask 261120   ;;  %s412_s7 = int_to_ptr.vmem [resolvable:$true] %s411_s7 }
  0x26   : > { %v265_v4 = vand.u32 4294901760, %v246_v3  ;;  %s413_s8 = sshll.u32 %s409_s5, 4  ;;  %s397_s12 = scalar_lea.sflag [#allocation4], %s847_s19  ;;  %s414_s8 = int_to_ptr.hbm [resolvable:$true] %s413_s8 }
  0x27   : > { %v290_v5 = vsub.f32 %v243_v0, %v263_v2  ;;  %340 = vmatpush.msra.mxu3 %v263_v2  ;;  %264 = vmatpush.msra.mxu0 %v263_v2  ;;  %s681_s15 = sshra.s32 %s414_s8, 4  ;;  %s687_s28 = scalar_lea.hbm %s905_s2, 16  ;;  %s682_s15 = int_to_ptr.hbm [resolvable:$true] %s681_s15 }
  0x28   : > { %v266_v6 = vsub.f32 %v246_v3, %v265_v4  ;;  %s683_s16 = scalar_lea.hbm %s682_s15, 8  ;;  %p688_p7 = scmp.lt.s32.totalorder %s682_s15, %s905_s2 }
  0x29   : > { %317 = vmatpush.msra.mxu2 %v290_v5  ;;  %v291_v7 = vand.u32 4294901760, %v290_v5  ;;  %p684_p4 = scmp.ne.s32.totalorder %s682_s15, %s683_s16  ;;  %p689_p8 = scmp.lt.s32.totalorder %s687_s28, %s683_s16 }
  0x2a   : > { %320 = vmatmul.f32.vlgmr.msra.gmra.mxu2 %v266_v6  ;;  %v267_v8 = vand.u32 4294901760, %v266_v6 }
  0x2b   : > { %v292_v9 = vsub.f32 %v290_v5, %v291_v7  ;;  %366 = vmatpush.msrb.mxu0 %v291_v7  ;;  %p685_p5 = pnand %p684_p4, %p821_p9  ;;  %p690_p10 = por %p689_p8, %p688_p7 }
  0x2c   : > { %344 = vmatmul.f32.vlgmr.msra.gmra.mxu3 %v267_v8  ;;  %v268_v10 = vsub.f32 %v266_v6, %v267_v8 }
  0x2d   : > { %v293_v11 = vand.u32 4294901760, %v292_v9  ;;  %p686_p6 = pneg %p685_p5 }
  0x2e   : > { %v269_v12 = vand.u32 4294901760, %v268_v10 }
  0x2f   : > { %294 = vmatpush.msra.mxu1 %v293_v11  ;;  %p691_p13 = pnand %p690_p10, %p686_p6 }
  0x30   : > { %270 = vmatmul.f32.vlgmr.msra.gmra.mxu0 %v269_v12  ;;  %296 = vmatmul.f32.vlgmr.msra.gmra.mxu1 %v265_v4 }
  0x31   : > { %388 = vmatpush.msrb.mxu1 %v263_v2 }
  0x38   : > { %368 = vmatmul.f32.vlgmr.msrb.gmra.mxu0 %v265_v4  ;;  %390 = vmatmul.f32.vlgmr.msrb.gmra.mxu1 %v265_v4 }
  0xad   : > { %v271_v13 = vpop.f32.mrf.mxu0  ;;  %v297_v14 = vpop.f32.mrf.mxu1 }
  0xae   : > { %v298_v15 = vadd.f32 %v297_v14, %v271_v13  ;;  %v321_v16 = vpop.f32.mrf.mxu2 }
  0xaf   : > { %v345_v18 = vpop.f32.mrf.mxu3 }
  0xb0   : > { %v322_v17 = vadd.f32 %v321_v16, %v298_v15 }
  0xb2   : > { %v346_v19 = vadd.f32 %v345_v18, %v322_v17 }
  0xb5   : > { %v369_v20 = vpop.f32.mrf.mxu0  ;;  %v391_v21 = vpop.f32.mrf.mxu1 }
  0xb6   : > { %v370_v22 = vadd.f32 %v369_v20, %v346_v19 }
  0xb8   : > { %v392_v23 = vadd.f32 %v391_v21, %v370_v22 }
  0xba   : > { %395 = vst.msk [vmem:[%s241_s6] sm:$0xff] %vm394_vm1, %v392_v23 }
  0xbb   : > { %694 = shalt.err (!%p691_p13)
}
  0xbc   : > { %544 = dma.vmem_to_hbm [thread:$0]  (%p821_p9), %s412_s7, 128, %s414_s8, %s397_s12  }
  0xbd PF: > { %s425_s19 = sand.u32 1, %s733_s9   ;;  %p554_p0 = pnand %p527_p12, %p828_p11 }
  0xbe   : > { %s426_s3 = scalar_lea.sflag [#allocation4], %s425_s19 }
  0xbf   : > { %p555_p1 = pneg %p554_p0 }
  0xc1   : > { %728 = dma.done.wait (%p555_p1), %s426_s3, 128  }
  0xc2   : > { %730 = vsyncadd (%p555_p1), %s426_s3, 4294967168  ;;  %s21_s14 = sadd.s32 1, %s753_s14   ;;  %s910_s9 = smov %s737_s10 }
  0xc3   : > { %p18_p2 = scmp.ge.s32.totalorder %s21_s14, 4   ;;  %s911_s10 = smov %s741_s11 }
  0xc4   : > { %s912_s11 = smov %s826_s23  ;;  %s913_s12 = smov %s749_s13 }
  0xc5   : > { %s914_s13 = smov %s916_s17  ;;  %20 = sbr.rel (!%p18_p2) target bundleno = 8 (0x8), region = 86 }
  0xca   :  { %432 = vsyncpa [#allocation3], 1 }
  0xcb   :  { %434 = vsyncpa [#allocation3 + $0x1], 1 }
  0xcc   :  { %435 = vsyncpa [#allocation6], 1 }
  0xcd   :  { %437 = vsyncpa [#allocation6 + $0x1], 1 }
  0xce   :  { %438 = vsyncpa [#allocation4], 1 }
  0xcf   :  { %440 = vsyncpa [#allocation4 + $0x1], 1 }

</bundles_post_ra>
